<compile_context>
chip_gen: v6e
topology: v6e:2x2x1
jax: 0.10.0
libtpu: 0.0.40
codegen_flags: <defaults>
</compile_context>

<pallas_src>
import jax
import jax.numpy as jnp
from jax.experimental import pallas as pl
from jax.experimental.pallas import tpu as pltpu


def _lafa_kernel(feat_ref, conv_ref, w1_ref, b1_ref, w2_ref, b2_ref, out_ref):
    f = feat_ref[0]            # (tn, I, D)   un-padded features
    c = conv_ref[0]            # (tn, I, Dp)  conv features
    w1 = w1_ref[0]             # (D, Dp)  rows >= D of the original weight never matter
    b1 = b1_ref[0]             # (1, Dp)
    w2 = w2_ref[0]             # (Dp, Dp)
    b2 = b2_ref[0]             # (1, Dp)

    tn, I, D = f.shape
    Dp = c.shape[-1]

    # mean over the points-per-cluster axis I
    s1 = jnp.mean(f, axis=1)   # (tn, D)
    s2 = jnp.mean(c, axis=1)   # (tn, Dp)

    # per-stack single-layer MLPs on the MXU
    z1 = jnp.dot(s1, w1, preferred_element_type=jnp.float32) + b1   # (tn, Dp)
    z2 = jnp.dot(s2, w2, preferred_element_type=jnp.float32) + b2   # (tn, Dp)

    # softmax over the pair (z1, z2) == sigmoid(z1 - z2): one exp, numerically stable
    d = z1 - z2
    e = jnp.exp(-jnp.abs(d))
    inv = 1.0 / (1.0 + e)
    m1 = jnp.where(d >= 0.0, inv, e * inv)   # (tn, Dp)
    m2 = 1.0 - m1                            # (tn, Dp)

    # zero-pad the feature tile in VMEM only (cheap); padded channels contribute
    # zero to the aggregation, matching F.pad(..., (0, Dp - D)) in the reference.
    if Dp > D:
        f = jnp.concatenate(
            [f, jnp.zeros((tn, I, Dp - D), dtype=f.dtype)], axis=-1)

    # adaptive aggregation, gates broadcast over the I axis
    out_ref[0] = m1[:, None, :] * f + m2[:, None, :] * c


def _round_up(x, m):
    return -(-x // m) * m


def lafa_stack_forward(feature_matrix_batch, conv_feature_matrix_batch,
                       w1, b1, w2, b2, *,
                       vmem_budget_bytes=12 * 1024 * 1024):
    """feature_matrix_batch: (S, N, I, D) f32   (NOT padded)
       conv_feature_matrix_batch: (S, N, I, Dp) f32, Dp >= D
       w1, w2: (S, Dp, Dp);  b1, b2: (S, 1, Dp)
       returns (S, N, I, Dp)"""
    S, N, I, D = feature_matrix_batch.shape
    Sc, Nc, Ic, Dp = conv_feature_matrix_batch.shape
    assert (S, N, I) == (Sc, Nc, Ic) and Dp >= D

    # Only the first D input channels of mlp1 ever see non-zero (zero-padded)
    # input, so slice its weight instead of padding the big activation tensor.
    w1_eff = w1[:, :D, :]                      # (S, D, Dp), exact

    # ---- choose the N tile: largest divisor of N whose double-buffered
    # feat+conv+out tiles (with lane/sublane padding) fit the VMEM budget ----
    row_bytes = 4 * _round_up(I, 8) * (_round_up(D, 128) + 2 * _round_up(Dp, 128))
    cap = max(1, vmem_budget_bytes // (2 * row_bytes))   # x2 for double buffering
    tn = 1
    for cand in range(1, N + 1):
        if N % cand == 0 and cand <= cap:
            tn = cand
    nt = N // tn

    out = pl.pallas_call(
        _lafa_kernel,
        out_shape=jax.ShapeDtypeStruct((S, N, I, Dp), jnp.float32),
        grid_spec=pltpu.PrefetchScalarGridSpec(
            num_scalar_prefetch=0,
            grid=(S, nt),                               # n varies fastest -> weights reused
            in_specs=[
                pl.BlockSpec((1, tn, I, D), lambda s, n: (s, n, 0, 0)),   # feat (un-padded)
                pl.BlockSpec((1, tn, I, Dp), lambda s, n: (s, n, 0, 0)),  # conv
                pl.BlockSpec((1, D, Dp), lambda s, n: (s, 0, 0)),         # w1[:D, :]
                pl.BlockSpec((1, 1, Dp), lambda s, n: (s, 0, 0)),         # b1
                pl.BlockSpec((1, Dp, Dp), lambda s, n: (s, 0, 0)),        # w2
                pl.BlockSpec((1, 1, Dp), lambda s, n: (s, 0, 0)),         # b2
            ],
            out_specs=pl.BlockSpec((1, tn, I, Dp), lambda s, n: (s, n, 0, 0)),
        ),
        compiler_params=pltpu.CompilerParams(
            dimension_semantics=("parallel", "parallel"),
            vmem_limit_bytes=32 * 1024 * 1024,   # raises v5e's 16 MiB default, safe on v7x
        ),
    )(feature_matrix_batch, conv_feature_matrix_batch, w1_eff, b1, w2, b2)
    return out


def _reference(feat, conv, w1, b1, w2, b2):
    S, N, I, D = feat.shape
    Dp = conv.shape[-1]
    feat_pad = jnp.pad(feat, ((0, 0), (0, 0), (0, 0), (0, Dp - D)))
    s1 = jnp.mean(feat_pad, axis=2)          # (S, N, Dp)
    s2 = jnp.mean(conv, axis=2)
    z1 = jnp.einsum('snd,sde->sne', s1, w1) + b1
    z2 = jnp.einsum('snd,sde->sne', s2, w2) + b2
    gates = jax.nn.softmax(jnp.stack((z1, z2), axis=0), axis=0)
    m1, m2 = gates[0], gates[1]
    return m1[:, :, None, :] * feat_pad + m2[:, :, None, :] * conv


if __name__ == "__main__":
    # small shapes consistent with the module's forward
    S, N, I, D, Dp = 3, 16, 16, 16, 32   # stack, batch, points/cluster, in-feat, conv-feat

    key = jax.random.PRNGKey(0)
    k1, k2, k3, k4, k5, k6 = jax.random.split(key, 6)

    feat = jax.random.normal(k1, (S, N, I, D), dtype=jnp.float32)
    conv = jax.random.normal(k2, (S, N, I, Dp), dtype=jnp.float32)

    # deterministic per-stack Linear parameters (mlp1 / mlp2 modeled as Linear(Dp, Dp))
    scale = 1.0 / jnp.sqrt(jnp.float32(Dp))
    w1 = jax.random.uniform(k3, (S, Dp, Dp), jnp.float32, -scale, scale)
    b1 = jax.random.uniform(k4, (S, 1, Dp), jnp.float32, -scale, scale)
    w2 = jax.random.uniform(k5, (S, Dp, Dp), jnp.float32, -scale, scale)
    b2 = jax.random.uniform(k6, (S, 1, Dp), jnp.float32, -scale, scale)

    # Small VMEM budget only so these toy shapes actually exercise the
    # N-tiling path (tn=4, grid=(3,4)); real shapes use the 12 MiB default.
    out = lafa_stack_forward(feat, conv, w1, b1, w2, b2,
                             vmem_budget_bytes=256 * 1024)
    jax.block_until_ready(out)

    ref = _reference(feat, conv, w1, b1, w2, b2)
    assert out.shape == (S, N, I, Dp)
    assert jnp.allclose(out, ref, atol=1e-5, rtol=1e-5)

    print("KERNEL_OK")
</pallas_src>

<mosaic_0001>
module attributes {stable_mosaic.version = 11 : i64} {
  func.func @_lafa_kernel(%arg0: i32, %arg1: i32, %arg2: memref<1x4x16x16xf32, #tpu.memory_space<vmem>>, %arg3: memref<1x4x16x32xf32, #tpu.memory_space<vmem>>, %arg4: memref<1x16x32xf32, #tpu.memory_space<vmem>>, %arg5: memref<1x1x32xf32, #tpu.memory_space<vmem>>, %arg6: memref<1x32x32xf32, #tpu.memory_space<vmem>>, %arg7: memref<1x1x32xf32, #tpu.memory_space<vmem>>, %arg8: memref<1x4x16x32xf32, #tpu.memory_space<vmem>>) attributes {dimension_semantics = [#tpu.dimension_semantics<parallel>, #tpu.dimension_semantics<parallel>], iteration_bounds = array<i64: 3, 4>, scalar_prefetch = 0 : i64, scratch_operands = 0 : i64, tpu.core_type = #tpu.core_type<tc>, window_params = [{transform_indices = @transform_0, window_bounds = array<i64: 1, 4, 16, 16>}, {transform_indices = @transform_1, window_bounds = array<i64: 1, 4, 16, 32>}, {transform_indices = @transform_2, window_bounds = array<i64: 1, 16, 32>}, {transform_indices = @transform_3, window_bounds = array<i64: 1, 1, 32>}, {transform_indices = @transform_4, window_bounds = array<i64: 1, 32, 32>}, {transform_indices = @transform_5, window_bounds = array<i64: 1, 1, 32>}, {transform_indices = @transform_6, window_bounds = array<i64: 1, 4, 16, 32>}]} {
    %c0 = arith.constant 0 : index
    %c0_0 = arith.constant 0 : index
    %c0_1 = arith.constant 0 : index
    %c0_2 = arith.constant 0 : index
    %0 = vector.load %arg2[%c0, %c0_0, %c0_1, %c0_2] : memref<1x4x16x16xf32, #tpu.memory_space<vmem>>, vector<1x4x16x16xf32>
    %1 = vector.shape_cast %0 : vector<1x4x16x16xf32> to vector<4x16x16xf32>
    %c0_3 = arith.constant 0 : index
    %c0_4 = arith.constant 0 : index
    %c0_5 = arith.constant 0 : index
    %c0_6 = arith.constant 0 : index
    %2 = vector.load %arg3[%c0_3, %c0_4, %c0_5, %c0_6] : memref<1x4x16x32xf32, #tpu.memory_space<vmem>>, vector<1x4x16x32xf32>
    %3 = vector.shape_cast %2 : vector<1x4x16x32xf32> to vector<4x16x32xf32>
    %c0_7 = arith.constant 0 : index
    %c0_8 = arith.constant 0 : index
    %c0_9 = arith.constant 0 : index
    %4 = vector.load %arg4[%c0_7, %c0_8, %c0_9] : memref<1x16x32xf32, #tpu.memory_space<vmem>>, vector<1x16x32xf32>
    %5 = vector.shape_cast %4 : vector<1x16x32xf32> to vector<16x32xf32>
    %c0_10 = arith.constant 0 : index
    %c0_11 = arith.constant 0 : index
    %c0_12 = arith.constant 0 : index
    %6 = vector.load %arg5[%c0_10, %c0_11, %c0_12] : memref<1x1x32xf32, #tpu.memory_space<vmem>>, vector<1x1x32xf32>
    %7 = vector.shape_cast %6 : vector<1x1x32xf32> to vector<1x32xf32>
    %c0_13 = arith.constant 0 : index
    %c0_14 = arith.constant 0 : index
    %c0_15 = arith.constant 0 : index
    %8 = vector.load %arg6[%c0_13, %c0_14, %c0_15] : memref<1x32x32xf32, #tpu.memory_space<vmem>>, vector<1x32x32xf32>
    %9 = vector.shape_cast %8 : vector<1x32x32xf32> to vector<32x32xf32>
    %c0_16 = arith.constant 0 : index
    %c0_17 = arith.constant 0 : index
    %c0_18 = arith.constant 0 : index
    %10 = vector.load %arg7[%c0_16, %c0_17, %c0_18] : memref<1x1x32xf32, #tpu.memory_space<vmem>>, vector<1x1x32xf32>
    %11 = vector.shape_cast %10 : vector<1x1x32xf32> to vector<1x32xf32>
    %cst = arith.constant dense<0.000000e+00> : vector<4x16xf32>
    %12 = vector.multi_reduction <add>, %1, %cst [1] : vector<4x16x16xf32> to vector<4x16xf32>
    %cst_19 = arith.constant 1.600000e+01 : f32
    %13 = vector.broadcast %cst_19 : f32 to vector<4x16xf32>
    %14 = arith.divf %12, %13 : vector<4x16xf32>
    %cst_20 = arith.constant dense<0.000000e+00> : vector<4x32xf32>
    %15 = vector.multi_reduction <add>, %3, %cst_20 [1] : vector<4x16x32xf32> to vector<4x32xf32>
    %cst_21 = arith.constant 1.600000e+01 : f32
    %16 = vector.broadcast %cst_21 : f32 to vector<4x32xf32>
    %17 = arith.divf %15, %16 : vector<4x32xf32>
    %cst_22 = arith.constant dense<0.000000e+00> : vector<4x32xf32>
    %18 = tpu.matmul %14, %5, %cst_22 {dimension_numbers = #tpu.dot_dimension_numbers<[1], [0], [0], [1], [0, 0, 1, 1], [], []>} : vector<4x16xf32>, vector<16x32xf32>, vector<4x32xf32> -> vector<4x32xf32>
    %19 = vector.broadcast %7 : vector<1x32xf32> to vector<4x32xf32>
    %20 = arith.addf %18, %19 : vector<4x32xf32>
    %cst_23 = arith.constant dense<0.000000e+00> : vector<4x32xf32>
    %21 = tpu.matmul %17, %9, %cst_23 {dimension_numbers = #tpu.dot_dimension_numbers<[1], [0], [0], [1], [0, 0, 1, 1], [], []>} : vector<4x32xf32>, vector<32x32xf32>, vector<4x32xf32> -> vector<4x32xf32>
    %22 = vector.broadcast %11 : vector<1x32xf32> to vector<4x32xf32>
    %23 = arith.addf %21, %22 : vector<4x32xf32>
    %24 = arith.subf %20, %23 : vector<4x32xf32>
    %25 = math.absf %24 : vector<4x32xf32>
    %cst_24 = arith.constant 0.000000e+00 : f32
    %26 = vector.broadcast %cst_24 : f32 to vector<4x32xf32>
    %27 = arith.subf %26, %25 : vector<4x32xf32>
    %28 = math.exp %27 : vector<4x32xf32>
    %cst_25 = arith.constant 1.000000e+00 : f32
    %29 = vector.broadcast %cst_25 : f32 to vector<4x32xf32>
    %30 = arith.addf %29, %28 : vector<4x32xf32>
    %cst_26 = arith.constant 1.000000e+00 : f32
    %31 = vector.broadcast %cst_26 : f32 to vector<4x32xf32>
    %32 = arith.divf %31, %30 : vector<4x32xf32>
    %cst_27 = arith.constant 0.000000e+00 : f32
    %33 = vector.broadcast %cst_27 : f32 to vector<4x32xf32>
    %34 = arith.cmpf oge, %24, %33 : vector<4x32xf32>
    %35 = arith.mulf %28, %32 : vector<4x32xf32>
    %36 = arith.select %34, %32, %35 : vector<4x32xi1>, vector<4x32xf32>
    %cst_28 = arith.constant 1.000000e+00 : f32
    %37 = vector.broadcast %cst_28 : f32 to vector<4x32xf32>
    %38 = arith.subf %37, %36 : vector<4x32xf32>
    %cst_29 = arith.constant 0.000000e+00 : f32
    %39 = vector.broadcast %cst_29 : f32 to vector<4x16x16xf32>
    %40 = tpu.concatenate %1, %39 in 2 : vector<4x16x16xf32>, vector<4x16x16xf32> -> vector<4x16x32xf32>
    %41 = vector.shape_cast %36 : vector<4x32xf32> to vector<4x1x32xf32>
    %42 = vector.broadcast %41 : vector<4x1x32xf32> to vector<4x16x32xf32>
    %43 = arith.mulf %42, %40 : vector<4x16x32xf32>
    %44 = vector.shape_cast %38 : vector<4x32xf32> to vector<4x1x32xf32>
    %45 = vector.broadcast %44 : vector<4x1x32xf32> to vector<4x16x32xf32>
    %46 = arith.mulf %45, %3 : vector<4x16x32xf32>
    %47 = arith.addf %43, %46 : vector<4x16x32xf32>
    %c0_30 = arith.constant 0 : index
    %c0_31 = arith.constant 0 : index
    %c0_32 = arith.constant 0 : index
    %c0_33 = arith.constant 0 : index
    %48 = vector.load %arg8[%c0_30, %c0_31, %c0_32, %c0_33] : memref<1x4x16x32xf32, #tpu.memory_space<vmem>>, vector<1x4x16x32xf32>
    %49 = vector.shape_cast %48 : vector<1x4x16x32xf32> to vector<4x16x32xf32>
    %50 = vector.shape_cast %47 : vector<4x16x32xf32> to vector<1x4x16x32xf32>
    tpu.vector_store %arg8[%c0_30, %c0_31, %c0_32, %c0_33], %50 {strides = array<i32>} : memref<1x4x16x32xf32, #tpu.memory_space<vmem>>, vector<1x4x16x32xf32>,
    return
  }
  func.func @transform_0(%arg0: i32, %arg1: i32) -> (i32, i32, i32, i32) {
    %c0_i32 = arith.constant 0 : i32
    %c0_i32_0 = arith.constant 0 : i32
    %c0_i32_1 = arith.constant 0 : i32
    return %arg0, %arg1, %c0_i32, %c0_i32_0 : i32, i32, i32, i32
  }
  func.func @transform_1(%arg0: i32, %arg1: i32) -> (i32, i32, i32, i32) {
    %c0_i32 = arith.constant 0 : i32
    %c0_i32_0 = arith.constant 0 : i32
    %c0_i32_1 = arith.constant 0 : i32
    return %arg0, %arg1, %c0_i32, %c0_i32_0 : i32, i32, i32, i32
  }
  func.func @transform_2(%arg0: i32, %arg1: i32) -> (i32, i32, i32) {
    %c0_i32 = arith.constant 0 : i32
    %c0_i32_0 = arith.constant 0 : i32
    %c0_i32_1 = arith.constant 0 : i32
    return %arg0, %c0_i32, %c0_i32_0 : i32, i32, i32
  }
  func.func @transform_3(%arg0: i32, %arg1: i32) -> (i32, i32, i32) {
    %c0_i32 = arith.constant 0 : i32
    %c0_i32_0 = arith.constant 0 : i32
    %c0_i32_1 = arith.constant 0 : i32
    return %arg0, %c0_i32, %c0_i32_0 : i32, i32, i32
  }
  func.func @transform_4(%arg0: i32, %arg1: i32) -> (i32, i32, i32) {
    %c0_i32 = arith.constant 0 : i32
    %c0_i32_0 = arith.constant 0 : i32
    %c0_i32_1 = arith.constant 0 : i32
    return %arg0, %c0_i32, %c0_i32_0 : i32, i32, i32
  }
  func.func @transform_5(%arg0: i32, %arg1: i32) -> (i32, i32, i32) {
    %c0_i32 = arith.constant 0 : i32
    %c0_i32_0 = arith.constant 0 : i32
    %c0_i32_1 = arith.constant 0 : i32
    return %arg0, %c0_i32, %c0_i32_0 : i32, i32, i32
  }
  func.func @transform_6(%arg0: i32, %arg1: i32) -> (i32, i32, i32, i32) {
    %c0_i32 = arith.constant 0 : i32
    %c0_i32_0 = arith.constant 0 : i32
    %c0_i32_1 = arith.constant 0 : i32
    return %arg0, %arg1, %c0_i32, %c0_i32_0 : i32, i32, i32, i32
  }
}

</mosaic_0001>

<bundles_post_ra>
// kernel: tpu_custom_call.1
= control target key start
LH: loop header
LB: loop body
LE: loop exit
PB: predicated region body
PF: predicated region fallthrough
CT: control target
= control target key end

     0   :  { %s1992_s0 = inlined_call_operand.hbm [shape: f32[3,16,16,16], index: 0, kind: input, shape index: {}]   ;;  %s1993_s1 = inlined_call_operand.hbm [shape: f32[3,16,16,32], index: 1, kind: input, shape index: {}]   ;;  %s1994_s2 = inlined_call_operand.hbm [shape: f32[3,16,32], index: 2, kind: input, shape index: {}]   ;;  %s1995_s3 = inlined_call_operand.vmem [shape: f32[3,1,32], index: 3, kind: input, shape index: {}]   ;;  %s1996_s4 = inlined_call_operand.hbm [shape: f32[3,32,32], index: 4, kind: input, shape index: {}]   ;;  %s1997_s5 = inlined_call_operand.vmem [shape: f32[3,1,32], index: 5, kind: input, shape index: {}]   ;;  %s1998_s6 = inlined_call_operand.hbm [shape: f32[3,16,16,32], index: 6, kind: output, shape index: {}]  }
   0x1   :  { %2014 = sst [smem:[#allocation25_spill]] %s1992_s0 }
   0x2   :  { %2015 = sst [smem:[#allocation26_spill]] %s1993_s1 }
   0x3   :  { %2016 = sst [smem:[#allocation27_spill]] %s1994_s2 }
   0x4   :  { %2017 = sst [smem:[#allocation28_spill]] %s1995_s3 }
   0x5   :  { %2018 = sst [smem:[#allocation29_spill]] %s1997_s5 }
   0x6   :  { %2019 = sst [smem:[#allocation30_spill]] %s1998_s6 }
   0x7   :  { %11 = vsyncpa [#allocation3], 0 }
   0x8   :  { %13 = vsyncpa [#allocation3 + $0x1], 0 }
   0x9   :  { %14 = vsyncpa [#allocation6], 0 }
   0xa   :  { %16 = vsyncpa [#allocation6 + $0x1], 0 }
   0xb   :  { %17 = vsyncpa [#allocation9], 0 }
   0xc   :  { %19 = vsyncpa [#allocation9 + $0x1], 0 }
   0xd   :  { %20 = vsyncpa [#allocation4], 0 }
   0xe   :  { %22 = vsyncpa [#allocation4 + $0x1], 0  ;;  %s1539_s21 = smov 0   ;;  %s1541_s22 = smov 0  }
   0xf   :  { %s1543_s23 = smov 0   ;;  %s1545_s24 = smov 0  }
  0x10   :  { %s1547_s25 = smov 0   ;;  %s1549_s26 = smov 0  }
  0x11   :  { %s1551_s27 = smov 0   ;;  %s1553_s28 = smov 0  }
  0x12   :  { %s1555_s29 = smov 0   ;;  %s1557_s30 = smov 0  }
  0x13   :  { %s1559_s7 = smov 0  }
  0x14 LB: > { %2020 = sst [smem:[#allocation16_spill]] %s1462_s24  ;;  %s1595_s8 = sadd.s32 4294967295, %s1490_s7   ;;  %s1490_s7 = sphi %s1559_s7, %s28_s7   ;;  %s1486_s30 = sphi %s1557_s30, %s2065_s30   ;;  %s1482_s29 = sphi %s1555_s29, %s2056_s29   ;;  %s1478_s28 = sphi %s1553_s28, %s2064_s28   ;;  %s1474_s27 = sphi %s1551_s27, %s2055_s27   ;;  %s1470_s26 = sphi %s1549_s26, %s2063_s26   ;;  %s1466_s25 = sphi %s1547_s25, %s2062_s25   ;;  %s1462_s24 = sphi %s1545_s24, %s2061_s24   ;;  %s1458_s23 = sphi %s1543_s23, %s2060_s23   ;;  %s1454_s22 = sphi %s1541_s22, %s2059_s22   ;;  %s1450_s21 = sphi %s1539_s21, %s2058_s21  }
  0x15   : > { %2021 = sst [smem:[#allocation17_spill]] %s1474_s27  ;;  %s1051_s9 = sadd.s32 4294967294, %s1490_s7  }
  0x16   : > { %2022 = sst [smem:[#allocation18_spill]] %s1478_s28  ;;  %s37_s10 = sadd.s32 1, %s1482_s29 }
  0x17   : > { %2023 = sst [smem:[#allocation19_spill]] %s1482_s29  ;;  %s40_s11 = sadd.s32 1, %s1486_s30 }
  0x18   : > { %p38_p0 = scmp.ge.s32.totalorder %s37_s10, 4  ;;  %s49_s12 = sadd.s32 1, %s1470_s26 }
  0x19   : > { %p56_p1 = scmp.ne.s32.totalorder %s1470_s26, %s1466_s25  ;;  %p2010_p2 = scmp.eq.s32.totalorder %s1490_s7, 0 }
  0x1a   : > { %s2067_s10 = smov (%p38_p0, %s37_s10), 0  ;;  %s2069_s11 = smov (!%p38_p0, %s40_s11), %s1486_s30 }
  0x1b   : > { %2024 = sst [smem:[#allocation20_spill]] %s2067_s10  ;;  %s45_s13 = ssub.s32 %s1482_s29, %s2067_s10 }
  0x1c   : > { %p1611_p3 = por %p2010_p2, %p56_p1  ;;  %p42_p4 = scmp.ge.s32.totalorder %s2069_s11, 3 }
  0x1d   : > { %p62_p5 = scmp.ne.s32.totalorder %s1466_s25, %s1462_s24  ;;  %p2009_p6 = scmp.eq.s32.totalorder %s1595_s8, 0 }
  0x1e   : > { %p220_p7 = scmp.eq.s32.totalorder %s1595_s8, 11  ;;  %s2071_s11 = smov (%p42_p4, %s2069_s11), 0 }
  0x1f   : > { %2026 = sst [smem:[#allocation21_spill]] %s2071_s11  ;;  %p1623_p8 = por %p2009_p6, %p62_p5 }
  0x20   : > { %p1627_p9 = por %p220_p7, %p56_p1  ;;  %s1633_s17 = ssub.s32 %s1486_s30, %s2071_s11 }
  0x21   : > { %p226_p10 = scmp.eq.s32.totalorder %s1051_s9, 11  ;;  %s46_s18 = sor.u32 %s45_s13, %s1633_s17 }
  0x22   : > { %s2028_s16 = scalar_select %p1627_p9, 1, 0 }
  0x23   : > { %p47_p12 = scmp.eq.s32.totalorder %s46_s18, 0  ;;  %p1637_p13 = por %p226_p10, %p62_p5 }
  0x24   : > { %2029 = sst [smem:[#allocation22_spill]] %s2028_s16  ;;  %p2008_p0 = scmp.lt.s32.totalorder %s1490_s7, 12 }
  0x25   : > { %s2030_s19 = scalar_select %p1637_p13, 1, 0 }
  0x26   : > { %s1643_s20 = scalar_select %p47_p12, %s1470_s26, %s49_s12  }
  0x27   : > { %2031 = sst [smem:[#allocation23_spill]] %s2030_s19  ;;  %s2004_s10 = sand.u32 1, %s1470_s26  }
  0x28   : > { %2032 = sst [smem:[#allocation24_spill]] %s1643_s20  ;;  %s1087_s24 = sshll.u32 %s1482_s29, 3 }
  0x29   : > { %s1649_s11 = sshll.u32 %s2004_s10, 6  ;;  %s1057_s6 = sshll.u32 %s1486_s30, 5 }
  0x2a   : > { %s1652_s9 = sadd.s32 %s1087_s24, %s1057_s6  ;;  %p1658_p1 = pnand %p2008_p0, %p1611_p3 }
  0x2b   : > { %s1058_s12 = sshll.u32 %s1652_s9, 7  ;;  %s270_s18 = sand.u32 1, %s1490_s7  }
  0x2c   : > { %s2034_s1 = sld [smem:[#allocation26_spill]]  ;;  %s274_s19 = scalar_lea.vmem [#allocation5], %s1649_s11 }
  0x2d   : > { %s284_s6 = sshll.u32 %s274_s19, 4  ;;  %p1070_p4 = scmp.ge.s32.totalorder %s1490_s7, 1  ;;  %s285_s6 = int_to_ptr.vmem [resolvable:$true] %s284_s6 }
  0x2e   : > { %p346_p5 = scmp.lt.s32.totalorder %s1490_s7, 13  ;;  %s1672_s24 = scalar_lea.sflag [#allocation6], %s270_s18 }
  0x2f   : > { %p1248_p3 = pneg %p1658_p1  ;;  %s1259_s14 = scalar_lea.vmem %s285_s6, 1024 }
  0x30   : > { %p1260_p7 = scmp.ne.s32.totalorder %s285_s6, %s1259_s14  ;;  %s1492_s16 = smov [#allocation5]  }
  0x31   : > { %s1264_s27 = sshll.u32 %s1492_s16, 4  ;;  %s1265_s27 = int_to_ptr.vmem [resolvable:$false] %s1264_s27 }
  0x32   : > { %s283_s20 = scalar_lea.hbm %s2034_s1, %s1058_s12  ;;  %p1262_p10 = pnand %p1260_p7, %p1248_p3 }
  0x33   : > { %s1266_s29 = scalar_lea.vmem %s1265_s27, 2048  ;;  %p1267_p0 = scmp.lt.s32.totalorder %s285_s6, %s1265_s27 }
  0x34   : > { %p1263_p12 = pneg %p1262_p10  ;;  %p1268_p6 = scmp.lt.s32.totalorder %s1266_s29, %s1259_s14 }
  0x36   : > { %p1269_p2 = por %p1268_p6, %p1267_p0 }
  0x38   : > { %p1270_p11 = pnand %p1269_p2, %p1263_p12 }
  0x3a   : > { %1273 = shalt.err (!%p1270_p11)
}
  0x3b   : > { %s2012_s10 = smov 128   ;;  %s1494_s19 = smov 8  }
  0x3c   : > { %1134 = dma.hbm_to_vmem [thread:$0]  (!%p1658_p1), %s283_s20, 1024, %s285_s6, %s1672_s24, %s2012_s10, %s2012_s10, %s1494_s19  }
  0x3d   : > { %p1689_p6 = pnand %p1070_p4, %p346_p5  ;;  %s2036_s0 = sld [smem:[#allocation25_spill]] }
  0x3e   : > { %s250_s29 = scalar_lea.vmem [#allocation2], %s1649_s11  ;;  %s2037_s5 = sand.u32 1, %s1470_s26  }
  0x3f   : > { %s260_s1 = sshll.u32 %s250_s29, 4  ;;  %s247_s3 = scalar_lea.sflag [#allocation3], %s2037_s5  ;;  %s261_s1 = int_to_ptr.vmem [resolvable:$true] %s260_s1 }
  0x40   : > { %s1287_s28 = scalar_lea.vmem %s261_s1, 1024  ;;  %s1495_s20 = smov [#allocation2]  }
  0x41   : > { %p1288_p2 = scmp.ne.s32.totalorder %s261_s1, %s1287_s28  ;;  %s1292_s6 = sshll.u32 %s1495_s20, 4  ;;  %s1293_s6 = int_to_ptr.vmem [resolvable:$false] %s1292_s6 }
  0x42   : > { %s1294_s10 = scalar_lea.vmem %s1293_s6, 2048  ;;  %p1295_p4 = scmp.lt.s32.totalorder %s261_s1, %s1293_s6 }
  0x43   : > { %s259_s14 = scalar_lea.hbm %s2036_s0, %s1058_s12  ;;  %p1290_p11 = pnand %p1288_p2, %p1248_p3 }
  0x44   : > { %p1296_p5 = scmp.lt.s32.totalorder %s1294_s10, %s1287_s28 }
  0x45   : > { %p1291_p0 = pneg %p1290_p11 }
  0x46   : > { %p1297_p7 = por %p1296_p5, %p1295_p4 }
  0x48   : > { %p1298_p10 = pnand %p1297_p7, %p1291_p0 }
  0x4a   : > { %1301 = shalt.err (!%p1298_p10)
}
  0x4b   : > { %s2038_s11 = smov 128   ;;  %s103_s5 = sadd.s32 1, %s1458_s23 }
  0x4c   : > { %1131 = dma.hbm_to_vmem [thread:$0]  (!%p1658_p1), %s259_s14, 1024, %s261_s1, %s247_s3, %s2038_s11, %s2038_s11, %s1494_s19  }
  0x4d   : > { %p110_p3 = scmp.ne.s32.totalorder %s1458_s23, %s1454_s22  ;;  %p2039_p12 = scmp.eq.s32.totalorder %s1633_s17, 0 }
  0x4e   : > { %p2040_p2 = scmp.eq.s32.totalorder %s1490_s7, 0  ;;  %p116_p0 = scmp.ne.s32.totalorder %s1454_s22, %s1450_s21 }
  0x4f   : > { %s1715_s28 = scalar_select %p2039_p12, %s1458_s23, %s103_s5  }
  0x50   : > { %p112_p11 = por %p110_p3, %p2040_p2  ;;  %s1722_s9 = sand.u32 1, %s1458_s23  }
  0x51   : > { %s1089_s13 = sshll.u32 %s1486_s30, 8  ;;  %p2041_p4 = scmp.eq.s32.totalorder %s1595_s8, 0 }
  0x52   : > { %s1064_s10 = sshll.u32 %s1722_s9, 4  ;;  %s2043_s2 = sld [smem:[#allocation27_spill]] }
  0x53   : > { %p1727_p5 = por %p116_p0, %p2041_p4  ;;  %s298_s16 = scalar_lea.vmem [#allocation7], %s1064_s10 }
  0x54   : > { %s305_s18 = sshll.u32 %s298_s16, 4  ;;  %p2044_p1 = scmp.lt.s32.totalorder %s1490_s7, 12  ;;  %s306_s18 = int_to_ptr.vmem [resolvable:$true] %s305_s18 }
  0x55   : > { %s1067_s14 = sshll.u32 %s1722_s9, 5  ;;  %s1315_s29 = scalar_lea.vmem %s306_s18, 256 }
  0x56   : > { %p1737_p7 = pnand %p2044_p1, %p112_p11  ;;  %p1316_p3 = scmp.ne.s32.totalorder %s306_s18, %s1315_s29 }
  0x57   : > { %s1496_s20 = smov [#allocation7]  }
  0x58   : > { %s304_s17 = scalar_lea.hbm %s2043_s2, %s1089_s13  ;;  %p1304_p10 = pneg %p1737_p7 }
  0x59   : > { %s1320_s6 = sshll.u32 %s1496_s20, 4  ;;  %s1321_s6 = int_to_ptr.vmem [resolvable:$false] %s1320_s6 }
  0x5a   : > { %p1318_p12 = pnand %p1316_p3, %p1304_p10  ;;  %s1322_s5 = scalar_lea.vmem %s1321_s6, 512 }
  0x5b   : > { %p1323_p11 = scmp.lt.s32.totalorder %s306_s18, %s1321_s6  ;;  %p1324_p0 = scmp.lt.s32.totalorder %s1322_s5, %s1315_s29 }
  0x5c   : > { %p1319_p2 = pneg %p1318_p12 }
  0x5d   : > { %p1325_p4 = por %p1324_p0, %p1323_p11 }
  0x5f   : > { %p1326_p1 = pnand %p1325_p4, %p1319_p2 }
  0x61   : > { %1329 = shalt.err (!%p1326_p1)
}
  0x62   : > { %1137 = dma.hbm_to_vmem [thread:$0]  (!%p1737_p7), %s304_s17, 256, %s306_s18, %s1672_s24, %s2038_s11, %s2038_s11, %s1494_s19  }
  0x63   : > { %s1090_s13 = sshll.u32 %s1486_s30, 9  ;;  %s325_s16 = scalar_lea.vmem [#allocation8], %s1067_s14 }
  0x64   : > { %s331_s3 = scalar_lea.hbm %s1996_s4, %s1090_s13  ;;  %s332_s29 = sshll.u32 %s325_s16, 4  ;;  %s333_s29 = int_to_ptr.vmem [resolvable:$true] %s332_s29 }
  0x65   : > { %s322_s20 = scalar_lea.sflag [#allocation9], %s1722_s9  ;;  %s1343_s6 = scalar_lea.vmem %s333_s29, 512 }
  0x66   : > { %p1344_p3 = scmp.ne.s32.totalorder %s333_s29, %s1343_s6  ;;  %s1497_s5 = smov [#allocation8]  }
  0x67   : > { %s1348_s0 = sshll.u32 %s1497_s5, 4  ;;  %s1349_s0 = int_to_ptr.vmem [resolvable:$false] %s1348_s0 }
  0x68   : > { %p1346_p12 = pnand %p1344_p3, %p1304_p10  ;;  %s1350_s2 = scalar_lea.vmem %s1349_s0, 1024 }
  0x69   : > { %p1351_p11 = scmp.lt.s32.totalorder %s333_s29, %s1349_s0  ;;  %p1352_p0 = scmp.lt.s32.totalorder %s1350_s2, %s1343_s6 }
  0x6a   : > { %p1347_p2 = pneg %p1346_p12 }
  0x6b   : > { %p1353_p4 = por %p1352_p0, %p1351_p11 }
  0x6d   : > { %p1354_p1 = pnand %p1353_p4, %p1347_p2 }
  0x6f   : > { %1357 = shalt.err (!%p1354_p1)
}
  0x70   : > { %1140 = dma.hbm_to_vmem [thread:$0]  (!%p1737_p7), %s331_s3, 512, %s333_s29, %s322_s20, %s2038_s11, %s2038_s11, %s1494_s19  }
  0x71   : > { %350 = sbr.rel (%p1689_p6) target bundleno = 428 (0x1ac), region = 44  ;;  %s1769_s24 = sand.u32 (!%p1689_p6), 1, %s1466_s25  }
  0x72   : > { %s1772_s0 = sshll.u32 (!%p1689_p6), %s1769_s24, 6  ;;  %s353_s2 = scalar_lea.sflag (!%p1689_p6), [#allocation3], %s1769_s24 }
  0x73   : > { %s1776_s9 = scalar_lea.vmem (!%p1689_p6), [#allocation2], %s1772_s0 }
  0x76   : > { %1429 = dma.done.wait (%p1623_p8), %s353_s2, 1024  }
  0x77   : > { %1431 = vsyncadd (%p1623_p8), %s353_s2, 4294966272  ;;  %s361_s19 = sand.u32 1, %s1595_s8   ;;  %s1784_s11 = scalar_lea.vmem [#allocation5], %s1772_s0 }
  0x78   : > { %s362_s27 = scalar_lea.sflag [#allocation6], %s361_s19 }
  0x79   : > { %1433 = dma.done.wait (%p1623_p8), %s362_s27, 1024  }
  0x7a   : > { %1435 = vsyncadd (%p1623_p8), %s362_s27, 4294966272  ;;  %s372_s17 = sand.u32 1, %s1454_s22  }
  0x7b   : > { %s1073_s18 = sshll.u32 %s372_s17, 4 }
  0x7c   : > { %s374_s21 = scalar_lea.vmem [#allocation7], %s1073_s18 }
  0x7d   : > { %1437 = dma.done.wait (%p1727_p5), %s362_s27, 256  }
  0x7e   : > { %1439 = vsyncadd (%p1727_p5), %s362_s27, 4294967040  ;;  %s1074_s8 = sshll.u32 %s372_s17, 5  ;;  %s380_s14 = scalar_lea.sflag [#allocation9], %s372_s17 }
  0x7f   : > { %s383_s13 = scalar_lea.vmem [#allocation8], %s1074_s8 }
  0x80   : > { %1441 = dma.done.wait (%p1727_p5), %s380_s14, 512  }
  0x81   : > { %1443 = vsyncadd (%p1727_p5), %s380_s14, 4294966784  ;;  %v1498_v0 = vmov 0.0   ;;  %vm1499_vm0 = vmmov 0   ;;  %v464_v1 = vld [vmem:[%s383_s13 + $0x18] sm:$0xff]  ;;  %v463_v2 = vld [vmem:[%s383_s13 + $0x10] sm:$0xff]  ;;  %vm466_vm1 = vcmask 130048  }
  0x82   : > { %1107 = vmatprep.subr.mxu1 %v1498_v0  ;;  %1100 = vmatprep.subr.mxu0 %v1498_v0  ;;  %v459_v3 = vld [vmem:[%s374_s21 + $0x8] sm:$0xff]  ;;  %v458_v5 = vld [vmem:[%s374_s21] sm:$0xff]  ;;  %vm508_vm2 = vcmask 261120   ;;  %vm559_vm3 = vcmask 1041409   ;;  %vm561_vm4 = vcmask 1042434   ;;  %vm563_vm5 = vcmask 1043459  }
  0x83   : > { %1104 = vmatprep.mubr.msk.f32.mxu0 %vm1499_vm0, %v1498_v0  ;;  %1115 = vmatprep.mubr.msk.f32.mxu1 %vm1499_vm0, %v1498_v0  ;;  %v462_v4 = vld [vmem:[%s383_s13 + $0x8] sm:$0xff]  ;;  %v461_v6 = vld [vmem:[%s383_s13] sm:$0xff]  ;;  %v444_v9 = vld [vmem:[%s1776_s9 + $0x10] sm:$0xff]  ;;  %s2046_s15 = sld [smem:[#allocation18_spill]]  ;;  %s432_s17 = scalar_lea.vmem [#allocation10], %s1772_s0 }
  0x84   : > { %1108 = vmatpush3.msra.mxu1 %v464_v1  ;;  %1101 = vmatpush3.msra.mxu0 %v459_v3  ;;  %v442_v7 = vld [vmem:[%s1776_s9] sm:$0xff]  ;;  %v443_v8 = vld [vmem:[%s1776_s9 + $0x8] sm:$0xff]  ;;  %v445_v10 = vld [vmem:[%s1776_s9 + $0x18] sm:$0xff]  ;;  %v1812_v15 = vsel %vm466_vm1, %v444_v9, 0.0  ;;  %s2047_s3 = sld [smem:[#allocation28_spill]]  ;;  %s873_s18 = sshll.u32 %s432_s17, 4  ;;  %s1924_s18 = int_to_ptr.vmem [resolvable:$true] %s873_s18 }
  0x85   : > { %1109 = vmatprep.subr.mxu1 %v1498_v0  ;;  %1102 = vmatprep.subr.mxu0 %v1498_v0  ;;  %v446_v11 = vld [vmem:[%s1776_s9 + $0x20] sm:$0xff]  ;;  %v447_v12 = vld [vmem:[%s1776_s9 + $0x28] sm:$0xff]  ;;  %v1806_v13 = vsel %vm466_vm1, %v442_v7, 0.0  ;;  %v1809_v14 = vsel %vm466_vm1, %v443_v8, 0.0  ;;  %v448_v16 = vld [vmem:[%s1776_s9 + $0x30] sm:$0xff]  ;;  %v1819_v19 = vsel %vm466_vm1, %v445_v10, 0.0 }
  0x86   : > { %1110 = vmatpush3.msra.mxu1 %v463_v2  ;;  %1103 = vmatpush3.msra.mxu0 %v458_v5  ;;  %v449_v17 = vld [vmem:[%s1776_s9 + $0x38] sm:$0xff]  ;;  %v469_v18 = vadd.f32 %v1809_v14, %v1806_v13  ;;  %v1822_v20 = vsel %vm466_vm1, %v446_v11, 0.0  ;;  %v1825_v21 = vsel %vm466_vm1, %v447_v12, 0.0  ;;  %v1828_v22 = vld [vmem:[%s1784_s11] sm:$0xff]  ;;  %v478_v23 = vadd.f32 %v1819_v19, %v1812_v15  ;;  %v1841_v27 = vld [vmem:[%s1784_s11 + $0x8] sm:$0xff]  ;;  %s2048_s6 = sld [smem:[#allocation29_spill]] }
  0x87   : > { %1111 = vmatprep.subr.mxu1 %v1498_v0  ;;  %v487_v24 = vadd.f32 %v1825_v21, %v1822_v20  ;;  %v1835_v25 = vsel %vm466_vm1, %v448_v16, 0.0  ;;  %v1838_v26 = vsel %vm466_vm1, %v449_v17, 0.0  ;;  %v1844_v28 = vld [vmem:[%s1784_s11 + $0x10] sm:$0xff]  ;;  %v1847_v29 = vld [vmem:[%s1784_s11 + $0x18] sm:$0xff]  ;;  %v1852_v32 = vld [vmem:[%s1784_s11 + $0x20] sm:$0xff]  ;;  %v509_v33 = vsel %vm508_vm2, %v1828_v22, 0.0 }
  0x88   : > { %1112 = vmatpush3.msra.mxu1 %v462_v4  ;;  %v470_v30 = vrot.slane %v469_v18, 4  ;;  %v496_v31 = vadd.f32 %v1838_v26, %v1835_v25  ;;  %v510_v34 = vsel %vm508_vm2, %v1841_v27, 0.0  ;;  %v479_v35 = vrot.slane %v478_v23, 4  ;;  %v1859_v37 = vld [vmem:[%s1784_s11 + $0x28] sm:$0xff]  ;;  %v1862_v38 = vld [vmem:[%s1784_s11 + $0x30] sm:$0xff]  ;;  %v1871_v47 = vld [vmem:[%s1784_s11 + $0x38] sm:$0xff] }
  0x89   : > { %1113 = vmatprep.subr.mxu1 %v1498_v0  ;;  %v488_v36 = vrot.slane %v487_v24, 4  ;;  %v511_v39 = vadd.f32 %v510_v34, %v509_v33  ;;  %v518_v40 = vsel %vm508_vm2, %v1844_v28, 0.0  ;;  %v519_v43 = vsel %vm508_vm2, %v1847_v29, 0.0  ;;  %p435_p8 = scmp.lt.s32.totalorder %s2046_s15, 2  ;;  %s2049_s2 = sld [smem:[#allocation17_spill]] }
  0x8a   : > { %1114 = vmatpush3.msra.mxu1 %v461_v6  ;;  %v471_v41 = vadd.f32 %v470_v30, %v469_v18  ;;  %v497_v42 = vrot.slane %v496_v31, 4  ;;  %v527_v44 = vsel %vm508_vm2, %v1852_v32, 0.0  ;;  %v480_v45 = vadd.f32 %v479_v35, %v478_v23  ;;  %s1083_s19 = sshll.u32 %s2046_s15, 5  ;;  %s2051_s14 = sld [smem:[#allocation30_spill]] }
  0x8b   : > { %v489_v46 = vadd.f32 %v488_v36, %v487_v24  ;;  %v512_v48 = vrot.slane %v511_v39, 4  ;;  %v520_v49 = vadd.f32 %v519_v43, %v518_v40  ;;  %v528_v52 = vsel %vm508_vm2, %v1859_v37, 0.0  ;;  %s436_s12 = scalar_select %p435_p8, %s2046_s15, 2 }
  0x8c   : > { %v472_v50 = vrot.slane %v471_v41, 2  ;;  %v498_v51 = vadd.f32 %v497_v42, %v496_v31  ;;  %v536_v53 = vsel %vm508_vm2, %v1862_v38, 0.0  ;;  %v481_v54 = vrot.slane %v480_v45, 2  ;;  %s857_s15 = scalar_lea.sflag [#allocation4], %s1769_s24  ;;  %s1501_s10 = smov [#allocation10]  }
  0x8d   : > { %v490_v55 = vrot.slane %v489_v46, 2  ;;  %v513_v56 = vadd.f32 %v512_v48, %v511_v39  ;;  %v521_v57 = vrot.slane %v520_v49, 4  ;;  %v529_v60 = vadd.f32 %v528_v52, %v527_v44  ;;  %s437_s16 = scalar_lea.vmem %s2047_s3, %s436_s12  ;;  %s440_s5 = scalar_lea.vmem %s2048_s6, %s436_s12 }
  0x8e   : > { %v473_v58 = vadd.f32 %v472_v50, %v471_v41  ;;  %v499_v59 = vrot.slane %v498_v51, 2  ;;  %v537_v61 = vsel %vm508_vm2, %v1871_v47, 0.0  ;;  %v482_v62 = vadd.f32 %v481_v54, %v480_v45  ;;  %s1358_s12 = scalar_lea.vmem %s1924_s18, 1024  ;;  %s1362_s1 = sshll.u32 %s1501_s10, 4  ;;  %s1363_s1 = int_to_ptr.vmem [resolvable:$false] %s1362_s1 }
  0x8f   : > { %v491_v63 = vadd.f32 %v490_v55, %v489_v46  ;;  %v514_v0 = vrot.slane %v513_v56, 2  ;;  %v522_v1 = vadd.f32 %v521_v57, %v520_v49  ;;  %v530_v4 = vrot.slane %v529_v60, 4  ;;  %s1091_s9 = sshll.u32 %s2049_s2, 3  ;;  %p1359_p6 = scmp.ne.s32.totalorder %s1924_s18, %s1358_s12 }
  0x90   : > { %v474_v2 = vrot.slane %v473_v58, 1  ;;  %v500_v3 = vadd.f32 %v499_v59, %v498_v51  ;;  %v538_v5 = vadd.f32 %v537_v61, %v536_v53  ;;  %v483_v6 = vrot.slane %v482_v62, 1  ;;  %s1901_s27 = sadd.s32 %s1091_s9, %s1083_s19  ;;  %s1364_s3 = scalar_lea.vmem %s1363_s1, 2048 }
  0x91   : > { %v492_v7 = vrot.slane %v491_v63, 1  ;;  %v515_v8 = vadd.f32 %v514_v0, %v513_v56  ;;  %v523_v9 = vrot.slane %v522_v1, 2  ;;  %v531_v12 = vadd.f32 %v530_v4, %v529_v60  ;;  %v1078_v0 = vld [vmem:[%s440_s5] ss:$0 sm:$0xff]  ;;  %s1084_s11 = sshll.u32 %s1901_s27, 7  ;;  %p1360_p5 = pnand %p1359_p6, %p1627_p9 }
  0x92   : > { %v475_v10 = vadd.f32 %v474_v2, %v473_v58  ;;  %v501_v11 = vrot.slane %v500_v3, 1  ;;  %v539_v16 = vrot.slane %v538_v5, 4  ;;  %v484_v17 = vadd.f32 %v483_v6, %v482_v62  ;;  %s1922_s13 = scalar_lea.hbm %s2051_s14, %s1084_s11  ;;  %p1365_p10 = scmp.lt.s32.totalorder %s1924_s18, %s1363_s1 }
  0x93   : > { %v493_v18 = vadd.f32 %v492_v7, %v491_v63  ;;  %v516_v23 = vrot.slane %v515_v8, 1  ;;  %v524_v24 = vadd.f32 %v523_v9, %v522_v1  ;;  %v532_v33 = vrot.slane %v531_v12, 2  ;;  %v1076_v63 = vld [vmem:[%s437_s16] ss:$0 sm:$0xff]  ;;  %p1361_p7 = pneg %p1360_p5  ;;  %p1366_p3 = scmp.lt.s32.totalorder %s1364_s3, %s1358_s12 }
  0x94   : > { %v502_v30 = vadd.f32 %v501_v11, %v500_v3  ;;  %v504_v31 = vmul.f32 0.0625, %v475_v10  ;;  %v540_v34 = vadd.f32 %v539_v16, %v538_v5  ;;  %v505_v35 = vmul.f32 0.0625, %v484_v17 }
  0x95   : > { %v506_v36 = vmul.f32 0.0625, %v493_v18  ;;  %v517_v39 = vadd.f32 %v516_v23, %v515_v8  ;;  %v525_v40 = vrot.slane %v524_v24, 1  ;;  %v533_v42 = vadd.f32 %v532_v33, %v531_v12  ;;  %p1367_p12 = por %p1366_p3, %p1365_p10 }
  0x96   : > { %v507_v41 = vmul.f32 0.0625, %v502_v30  ;;  %v541_v43 = vrot.slane %v540_v34, 2  ;;  %v560_v44 = vsel %vm559_vm3, %v505_v35, %v504_v31  ;;  %v1500_v11 = vmov 1966171168  }
  0x97   : > { %v526_v45 = vadd.f32 %v525_v40, %v524_v24  ;;  %v545_v46 = vmul.f32 0.0625, %v517_v39  ;;  %v562_v48 = vsel %vm561_vm4, %v506_v36, %v560_v44  ;;  %v534_v49 = vrot.slane %v533_v42, 1  ;;  %p1368_p2 = pnand %p1367_p12, %p1361_p7 }
  0x98   : > { %v542_v50 = vadd.f32 %v541_v43, %v540_v34  ;;  %v564_v51 = vsel %vm563_vm5, %v507_v41, %v562_v48  ;;  %v736_v12 = vunpack.c.l.s4 %v1500_v11  ;;  %v738_v16 = vlaneseq }
  0x99   : > { %v546_v52 = vmul.f32 0.0625, %v526_v45  ;;  %1105 = vmatmul.mubr.msk.f32.vlgmr.msra.gmra.mxu0 %vm466_vm1, %v564_v51  ;;  %v535_v53 = vadd.f32 %v534_v49, %v533_v42 }
  0x9a   : > { %v543_v54 = vrot.slane %v542_v50, 1  ;;  %v737_v17 = vunpack.c.0.s8 %v736_v12  ;;  %v739_v18 = vshrl.u32 %v738_v16, 7 }
  0x9b   : > { %v647_v55 = vsel %vm559_vm3, %v546_v52, %v545_v46  ;;  %v547_v57 = vmul.f32 0.0625, %v535_v53 }
  0x9c   : > { %v544_v56 = vadd.f32 %v543_v54, %v542_v50  ;;  %v740_v24 = vsub.s32 %v737_v17, %v739_v18  ;;  %v761_v35 = vsub.s32 0, %v739_v18 }
  0x9d   : > { %v648_v59 = vsel %vm561_vm4, %v547_v57, %v647_v55 }
  0x9e   : > { %v548_v58 = vmul.f32 0.0625, %v544_v56 }
  0xa0   : > { %v649_v60 = vsel %vm563_vm5, %v548_v58, %v648_v59 }
  0xa1   : > { %1116 = vmatmul.mubr.msk.f32.vlgmr.msra.gmra.mxu1 %vm508_vm2, %v649_v60 }
 0x159   : > { %v633_v61 = vpop.f32.mrf.mxu0 }
 0x15a   : > { %v634_v1 = vadd.f32 %v1076_v63, %v633_v61 }
 0x15b   : > { %v1106_v62 = vpop.f32.mrf.mxu0 }
 0x161   : > { %v718_v2 = vpop.f32.mrf.mxu1 }
 0x162   : > { %v719_v3 = vadd.f32 %v1078_v0, %v718_v2 }
 0x163   : > { %v1117_v4 = vpop.f32.mrf.mxu1 }
 0x164   : > { %v722_v5 = vsub.f32 %v634_v1, %v719_v3 }
 0x166   : > { %v723_v6 = vand.u32 2147483647, %v722_v5  ;;  %vm730_vm6 = vcmp.ge.f32.partialorder %v722_v5, 0.0 }
 0x168   : > { %v724_v7 = vsub.f32 0.0, %v723_v6 }
 0x16a   : > { %v725_v8 = vmul.f32 1.442695, %v724_v7 }
 0x16c   : > { %1242 = vpow2.f32 %v725_v8 }
 0x179   : > { %v1243_v9 = vpop.eup %1242 }
 0x17a   : > { %v727_v10 = vadd.f32 1.0, %v1243_v9 }
 0x17c   : > { %1244 = vrcp.f32 %v727_v10 }
 0x189   : > { %v1245_v23 = vpop.eup %1244 }
 0x18a   : > { %v731_v30 = vmul.f32 %v1245_v23, %v1243_v9 }
 0x18c   : > { %v732_v31 = vsel %vm730_vm6, %v1245_v23, %v731_v30 }
 0x18d   : > { %v733_v33 = vsub.f32 1.0, %v732_v31  ;;  %v741_v34 = vrot.slane %v732_v31, %v740_v24 }
 0x18f   : > { %v742_v36 = vcombine.high %v741_v34, %v741_v34  ;;  %v749_v39 = vrot.slane %v741_v34, %v740_v24  ;;  %v794_v40 = vrot.slane %v733_v33, %v740_v24 }
 0x191   : > { %v756_v41 = vrot.slane %v742_v36, %v740_v24  ;;  %v757_v42 = vcombine.high %v749_v39, %v749_v39  ;;  %v762_v43 = vrot.slane %v749_v39, %v761_v35  ;;  %v795_v44 = vcombine.high %v794_v40, %v794_v40 }
 0x192   : > { %v802_v45 = vrot.slane %v794_v40, %v740_v24 }
 0x193   : > { %v758_v46 = vcombine.high %v756_v41, %v756_v41  ;;  %v766_v48 = vrot.slane %v756_v41, %v761_v35  ;;  %v770_v49 = vrot.slane %v757_v42, %v761_v35  ;;  %v779_v50 = vmul.f32 %v762_v43, %v1806_v13 }
 0x194   : > { %v809_v51 = vrot.slane %v795_v44, %v740_v24  ;;  %v810_v52 = vcombine.high %v802_v45, %v802_v45  ;;  %v815_v53 = vrot.slane %v802_v45, %v761_v35  ;;  %v780_v55 = vmul.f32 %v762_v43, %v1809_v14 }
 0x195   : > { %v774_v54 = vrot.slane %v758_v46, %v761_v35  ;;  %v781_v56 = vmul.f32 %v766_v48, %v1812_v15  ;;  %v782_v57 = vmul.f32 %v766_v48, %v1819_v19  ;;  %v783_v58 = vmul.f32 %v770_v49, %v1822_v20 }
 0x196   : > { %v811_v59 = vcombine.high %v809_v51, %v809_v51  ;;  %v819_v60 = vrot.slane %v809_v51, %v761_v35  ;;  %v823_v61 = vrot.slane %v810_v52, %v761_v35  ;;  %v784_v13 = vmul.f32 %v770_v49, %v1825_v21 }
 0x197   : > { %v785_v62 = vmul.f32 %v774_v54, %v1835_v25  ;;  %v832_v63 = vmul.f32 %v815_v53, %v1828_v22  ;;  %v833_v14 = vmul.f32 %v815_v53, %v1841_v27  ;;  %v786_v20 = vmul.f32 %v774_v54, %v1838_v26 }
 0x198   : > { %v827_v15 = vrot.slane %v811_v59, %v761_v35  ;;  %v834_v0 = vmul.f32 %v819_v60, %v1844_v28  ;;  %v835_v19 = vmul.f32 %v819_v60, %v1847_v29  ;;  %v836_v1 = vmul.f32 %v823_v61, %v1852_v32 }
 0x199   : > { %v837_v21 = vmul.f32 %v823_v61, %v1859_v37  ;;  %v840_v2 = vadd.f32 %v832_v63, %v779_v50  ;;  %v841_v25 = vadd.f32 %v833_v14, %v780_v55 }
 0x19a   : > { %v838_v22 = vmul.f32 %v827_v15, %v1862_v38  ;;  %v839_v27 = vmul.f32 %v827_v15, %v1871_v47  ;;  %v842_v3 = vadd.f32 %v834_v0, %v781_v56  ;;  %v843_v28 = vadd.f32 %v835_v19, %v782_v57 }
 0x19b   : > { %v844_v4 = vadd.f32 %v836_v1, %v783_v58  ;;  %v845_v29 = vadd.f32 %v837_v21, %v784_v13  ;;  %848 = vst.msk [vmem:[%s432_s17] sm:$0xff] %vm508_vm2, %v840_v2  ;;  %849 = vst.msk [vmem:[%s432_s17 + $0x8] sm:$0xff] %vm508_vm2, %v841_v25 }
 0x19c   : > { %v846_v26 = vadd.f32 %v838_v22, %v785_v62  ;;  %v847_v32 = vadd.f32 %v839_v27, %v786_v20  ;;  %850 = vst.msk [vmem:[%s432_s17 + $0x10] sm:$0xff] %vm508_vm2, %v842_v3  ;;  %851 = vst.msk [vmem:[%s432_s17 + $0x18] sm:$0xff] %vm508_vm2, %v843_v28 }
 0x19d   : > { %852 = vst.msk [vmem:[%s432_s17 + $0x20] sm:$0xff] %vm508_vm2, %v844_v4  ;;  %853 = vst.msk [vmem:[%s432_s17 + $0x28] sm:$0xff] %vm508_vm2, %v845_v29 }
 0x19e   : > { %854 = vst.msk [vmem:[%s432_s17 + $0x30] sm:$0xff] %vm508_vm2, %v846_v26  ;;  %855 = vst.msk [vmem:[%s432_s17 + $0x38] sm:$0xff] %vm508_vm2, %v847_v32 }
 0x19f   : > { %1371 = shalt.err (!%p1368_p2)
}
 0x1a0   : > { %s1372_s16 = scalar_lea.hbm %s1922_s13, 1024  ;;  %s1376_s6 = scalar_lea.hbm %s2051_s14, 12288 }
 0x1a1   : > { %p1373_p11 = scmp.ne.s32.totalorder %s1922_s13, %s1372_s16  ;;  %p1377_p1 = scmp.lt.s32.totalorder %s1922_s13, %s2051_s14 }
 0x1a2   : > { %p1378_p8 = scmp.lt.s32.totalorder %s1376_s6, %s1372_s16 }
 0x1a3   : > { %p1374_p0 = pnand %p1373_p11, %p1627_p9 }
 0x1a4   : > { %p1379_p6 = por %p1378_p8, %p1377_p1 }
 0x1a5   : > { %p1375_p4 = pneg %p1374_p0 }
 0x1a7   : > { %p1380_p5 = pnand %p1379_p6, %p1375_p4 }
 0x1a9   : > { %1383 = shalt.err (!%p1380_p5)
}
 0x1aa   : > { %s1502_s9 = smov 128   ;;  %s1503_s19 = smov 8  }
 0x1ab   : > { %1126 = dma.vmem_to_hbm [thread:$0]  (%p1627_p9), %s1924_s18, 1024, %s1922_s13, %s857_s15, %s1502_s9, %s1502_s9, %s1503_s19  }
 0x1ac PF: > { %s2052_s27 = sld [smem:[#allocation16_spill]]  ;;  %p1146_p7 = scmp.ge.s32.totalorder %s1490_s7, 2 }
 0x1ae   : > { %p1142_p10 = pnand %p1146_p7, %p1637_p13 }
 0x1b0   : > { %p1143_p3 = pneg %p1142_p10 }
 0x1b2   : > { %s888_s17 = sand.u32 1, %s2052_s27  }
 0x1b3   : > { %s889_s0 = scalar_lea.sflag [#allocation4], %s888_s17 }
 0x1b4   : > { %1445 = dma.done.wait (%p1143_p3), %s889_s0, 1024  }
 0x1b5   : > { %1447 = vsyncadd (%p1143_p3), %s889_s0, 4294966272  ;;  %s28_s7 = sadd.s32 1, %s1490_s7   ;;  %s2054_s18 = sld [smem:[#allocation24_spill]] }
 0x1b6   : > { %p25_p12 = scmp.ge.s32.totalorder %s28_s7, 14   ;;  %s2055_s27 = sld [smem:[#allocation19_spill]] }
 0x1b7   : > { %s2056_s29 = sld [smem:[#allocation20_spill]]  ;;  %s2058_s21 = smov %s1454_s22 }
 0x1b8   : > { %s2057_s8 = sld [smem:[#allocation21_spill]]  ;;  %s2059_s22 = smov %s1458_s23 }
 0x1b9   : > { %s2060_s23 = smov %s1715_s28  ;;  %s2061_s24 = smov %s1466_s25 }
 0x1ba   : > { %s2062_s25 = smov %s1470_s26  ;;  %s2064_s28 = smov %s1486_s30 }
 0x1bb   : > { %s2063_s26 = smov %s2054_s18  ;;  %27 = sbr.rel (!%p25_p12) target bundleno = 20 (0x14), region = 132 }
 0x1be   : > { %s2065_s30 = smov %s2057_s8 }
 0x1c0   :  { %894 = vsyncpa [#allocation3], 1 }
 0x1c1   :  { %896 = vsyncpa [#allocation3 + $0x1], 1 }
 0x1c2   :  { %897 = vsyncpa [#allocation6], 1 }
 0x1c3   :  { %899 = vsyncpa [#allocation6 + $0x1], 1 }
 0x1c4   :  { %900 = vsyncpa [#allocation9], 1 }
 0x1c5   :  { %902 = vsyncpa [#allocation9 + $0x1], 1 }
 0x1c6   :  { %903 = vsyncpa [#allocation4], 1 }
 0x1c7   :  { %905 = vsyncpa [#allocation4 + $0x1], 1 }

</bundles_post_ra>
